<compile_context>
chip_gen: v6e
topology: v6e:2x2x1
jax: 0.10.0
libtpu: 0.0.40
codegen_flags: <defaults>
</compile_context>

<pallas_src>
import functools

import numpy as np
import jax
import jax.numpy as jnp
from jax.experimental import pallas as pl
from jax.experimental.pallas import tpu as pltpu


def _issupcon_kernel(output_ref, labels_ref, iw_ref, fparams_ref, iparams_ref, loss_ref):
    # output_ref : [n_cls, B] f32   full prototype/score matrix (VMEM)
    # labels_ref : [1, B]     int32 per-sample class ids (VMEM)
    # iw_ref     : [1, B]     f32   raw importance weights (VMEM)
    # fparams_ref: [1]        f32   [1/temperature]              (SMEM)
    # iparams_ref: [2]        int32 [cur_task_lo, cur_task_hi)   (SMEM)
    # loss_ref   : [1]        f32   scalar loss                  (SMEM)
    n_cls, _ = output_ref.shape
    inv_temp = fparams_ref[0]
    lo = iparams_ref[0]
    hi = iparams_ref[1]

    labels = labels_ref[...]                                              # [1, B] int32
    row_cls = jax.lax.broadcasted_iota(jnp.int32, output_ref.shape, 0)    # [n_cls, B]

    # mask[c, j] = (c == labels[j])  -- rows of classes absent from the batch are all-zero
    mask = (row_cls == labels).astype(jnp.float32)                        # [n_cls, B]

    # anchor_dot_contrast and row-max subtraction (row = class, reduction over batch lanes)
    adc = output_ref[...] * inv_temp
    logits = adc - jnp.max(adc, axis=1, keepdims=True)

    # cur_task_mask: class // cls_per_task != target_labels[-1] // 2, expressed as a
    # range test (class not in [lo, hi)) to avoid vector integer division.
    row_not_cur = jnp.logical_or(row_cls < lo, row_cls >= hi).astype(jnp.float32)   # [n_cls, B]
    col_not_cur = jnp.logical_or(labels < lo, labels >= hi).astype(jnp.float32)     # [1, B]
    all_mask = row_not_cur * col_not_cur * (1.0 - mask)                   # score_scale_mask == 1

    # _importance_weight = iw * (mask * mask.sum(1, keepdims)).sum(0)  (per-column class counts)
    row_counts = jnp.sum(mask, axis=1, keepdims=True)                     # [n_cls, 1]
    sum_factor = jnp.sum(mask * row_counts, axis=0, keepdims=True)        # [1, B]
    log_w = jnp.log(iw_ref[...] * sum_factor)                             # [1, B] (single vreg EUP)

    _logits = logits - log_w * all_mask
    log_prob = logits - jnp.log(jnp.sum(jnp.exp(_logits), axis=1, keepdims=True))

    # IS_supcon_loss = -(log_prob * mask).sum() / mask.sum()
    loss_ref[0] = -jnp.sum(log_prob * mask) / jnp.sum(row_counts)


def is_supcon_loss(output, features, labels, importance_weight, *,
                   target_labels, n_cls, cls_per_task, temperature=0.07):
    """Pallas-backed ISSupConLoss.forward (labels path, score_mask=None). Fully jittable."""
    features = jnp.asarray(features)
    if features.ndim < 2:
        raise ValueError("`features` needs to be [bsz, ...]")
    if features.ndim > 2:
        features = features.reshape(features.shape[0], -1)
    batch_size = features.shape[0]

    labels = jnp.asarray(labels, jnp.int32).reshape(-1)
    if labels.shape[0] != batch_size:
        raise ValueError("Num of labels does not match num of features")

    output = jnp.asarray(output, jnp.float32)
    if output.shape != (n_cls, batch_size):
        raise ValueError("`output` must be [n_cls, batch_size]")

    # current-task class range [lo, hi)  <=>  class // cls_per_task == target_labels[-1] // 2
    half = int(target_labels[-1]) // 2
    lo = half * int(cls_per_task)
    hi = lo + int(cls_per_task)

    labels_2d = labels.reshape(1, batch_size)
    iw_2d = jnp.asarray(importance_weight, jnp.float32).reshape(1, batch_size)
    fparams = jnp.full((1,), 1.0 / float(temperature), jnp.float32)
    iparams = jnp.array([lo, hi], jnp.int32)

    cost = pl.CostEstimate(
        flops=16 * n_cls * batch_size,
        transcendentals=n_cls * batch_size + 2 * batch_size,
        bytes_accessed=4 * (2 * n_cls * batch_size + 2 * batch_size) + 16,
    )

    # Tiny problem: no grid, each input is one whole-array VMEM block; scalar loss in SMEM.
    loss = pl.pallas_call(
        _issupcon_kernel,
        out_shape=jax.ShapeDtypeStruct((1,), jnp.float32),
        in_specs=[
            pl.BlockSpec(memory_space=pltpu.MemorySpace.VMEM),   # output [n_cls, B]
            pl.BlockSpec(memory_space=pltpu.MemorySpace.VMEM),   # labels [1, B]
            pl.BlockSpec(memory_space=pltpu.MemorySpace.VMEM),   # importance weight [1, B]
            pl.BlockSpec(memory_space=pltpu.MemorySpace.SMEM),   # fparams [1]
            pl.BlockSpec(memory_space=pltpu.MemorySpace.SMEM),   # iparams [2]
        ],
        out_specs=pl.BlockSpec(memory_space=pltpu.MemorySpace.SMEM),
        cost_estimate=cost,
    )(output, labels_2d, iw_2d, fparams, iparams)
    return loss[0]


def _reference_loss_np(output, labels, iw, target_labels, n_cls, cls_per_task, temperature):
    """Float64 numpy replica of the PyTorch forward (labels path, score_mask=None)."""
    labels = np.asarray(labels).reshape(-1)
    all_labels = np.unique(labels)
    L = len(all_labels)
    mask = (all_labels[:, None] == labels[None, :]).astype(np.float64)
    proto = np.zeros((L, n_cls), np.float64)
    proto[np.arange(L), all_labels] = 1.0
    out = proto @ np.asarray(output, np.float64)
    adc = out / temperature
    logits = adc - adc.max(axis=1, keepdims=True)
    th = target_labels[-1] // 2
    task_all = all_labels // cls_per_task
    task_lab = labels // cls_per_task
    ctm = ((task_all != th).astype(np.float64)[:, None]
           * (task_lab != th).astype(np.float64)[None, :])
    iw_eff = np.asarray(iw, np.float64) * (mask * mask.sum(1, keepdims=True)).sum(0)
    all_mask = ctm * (1.0 - mask)
    _logits = logits - np.log(iw_eff)[None, :] * all_mask
    log_prob = logits - np.log(np.exp(_logits).sum(1, keepdims=True))
    return -(log_prob * mask).sum() / mask.sum()


if __name__ == "__main__":
    # Module config (synthetic opt): n_cls=10, cls_per_task=2, current task labels [4, 5].
    n_cls = 10
    cls_per_task = 2
    temperature = 0.07
    target_labels = [4, 5]

    B = 8          # batch size
    D = 32         # flattened feature dim (only used for the batch-size check, as in torch)

    key = jax.random.PRNGKey(0)
    k_out, k_feat, k_lab, k_iw = jax.random.split(key, 4)

    output = jax.random.normal(k_out, (n_cls, B), dtype=jnp.float32)       # [n_cls, B]
    features = jax.random.normal(k_feat, (B, D), dtype=jnp.float32)        # [B, D]
    labels = jax.random.randint(k_lab, (B,), 0, target_labels[-1] + 1)     # [B]
    importance_weight = jax.random.uniform(k_iw, (B,), jnp.float32,
                                           minval=0.5, maxval=1.5)         # [B], > 0

    loss_fn = jax.jit(functools.partial(
        is_supcon_loss,
        target_labels=target_labels, n_cls=n_cls,
        cls_per_task=cls_per_task, temperature=temperature))

    loss = loss_fn(output, features, labels, importance_weight)
    loss = jax.block_until_ready(loss)

    ref = _reference_loss_np(np.asarray(output), np.asarray(labels),
                             np.asarray(importance_weight), target_labels,
                             n_cls, cls_per_task, temperature)
    np.testing.assert_allclose(np.asarray(loss, np.float64), ref, rtol=2e-3, atol=2e-3)

    print("KERNEL_OK")
</pallas_src>

<mosaic_0001>
module attributes {stable_mosaic.version = 11 : i64} {
  func.func @_issupcon_kernel(%arg0: memref<10x8xf32, #tpu.memory_space<vmem>>, %arg1: memref<1x8xi32, #tpu.memory_space<vmem>>, %arg2: memref<1x8xf32, #tpu.memory_space<vmem>>, %arg3: memref<1xf32, #tpu.memory_space<smem>>, %arg4: memref<2xi32, #tpu.memory_space<smem>>, %arg5: memref<1xf32, #tpu.memory_space<smem>>) attributes {dimension_semantics = [], scalar_prefetch = 0 : i64, scratch_operands = 0 : i64, tpu.core_type = #tpu.core_type<tc>} {
    %c0 = arith.constant 0 : index
    %0 = memref.load %arg3[%c0] : memref<1xf32, #tpu.memory_space<smem>>
    %c0_0 = arith.constant 0 : index
    %1 = memref.load %arg4[%c0_0] : memref<2xi32, #tpu.memory_space<smem>>
    %c1 = arith.constant 1 : index
    %2 = memref.load %arg4[%c1] : memref<2xi32, #tpu.memory_space<smem>>
    %c0_1 = arith.constant 0 : index
    %c0_2 = arith.constant 0 : index
    %3 = vector.load %arg1[%c0_1, %c0_2] : memref<1x8xi32, #tpu.memory_space<vmem>>, vector<1x8xi32>
    %4 = tpu.iota {dimensions = array<i32: 0>} : vector<10x8xi32>
    %5 = vector.broadcast %3 : vector<1x8xi32> to vector<10x8xi32>
    %6 = arith.cmpi eq, %4, %5 : vector<10x8xi32>
    %7 = arith.extui %6 : vector<10x8xi1> to vector<10x8xi32>
    %8 = arith.sitofp %7 : vector<10x8xi32> to vector<10x8xf32>
    %c0_3 = arith.constant 0 : index
    %c0_4 = arith.constant 0 : index
    %9 = vector.load %arg0[%c0_3, %c0_4] : memref<10x8xf32, #tpu.memory_space<vmem>>, vector<10x8xf32>
    %10 = vector.broadcast %0 : f32 to vector<10x8xf32>
    %11 = arith.mulf %9, %10 : vector<10x8xf32>
    %cst = arith.constant dense<0xFF800000> : vector<10xf32>
    %12 = vector.multi_reduction <maximumf>, %11, %cst [1] : vector<10x8xf32> to vector<10xf32>
    %13 = vector.shape_cast %12 : vector<10xf32> to vector<10x1xf32>
    %14 = vector.broadcast %13 : vector<10x1xf32> to vector<10x8xf32>
    %15 = arith.subf %11, %14 : vector<10x8xf32>
    %16 = vector.broadcast %1 : i32 to vector<10x8xi32>
    %17 = arith.cmpi slt, %4, %16 : vector<10x8xi32>
    %18 = vector.broadcast %2 : i32 to vector<10x8xi32>
    %19 = arith.cmpi sge, %4, %18 : vector<10x8xi32>
    %20 = arith.ori %17, %19 : vector<10x8xi1>
    %21 = arith.extui %20 : vector<10x8xi1> to vector<10x8xi32>
    %22 = arith.sitofp %21 : vector<10x8xi32> to vector<10x8xf32>
    %23 = vector.broadcast %1 : i32 to vector<1x8xi32>
    %24 = arith.cmpi slt, %3, %23 : vector<1x8xi32>
    %25 = vector.broadcast %2 : i32 to vector<1x8xi32>
    %26 = arith.cmpi sge, %3, %25 : vector<1x8xi32>
    %27 = arith.ori %24, %26 : vector<1x8xi1>
    %28 = arith.extui %27 : vector<1x8xi1> to vector<1x8xi32>
    %29 = arith.sitofp %28 : vector<1x8xi32> to vector<1x8xf32>
    %30 = vector.broadcast %29 : vector<1x8xf32> to vector<10x8xf32>
    %31 = arith.mulf %22, %30 : vector<10x8xf32>
    %cst_5 = arith.constant 1.000000e+00 : f32
    %32 = vector.broadcast %cst_5 : f32 to vector<10x8xf32>
    %33 = arith.subf %32, %8 : vector<10x8xf32>
    %34 = arith.mulf %31, %33 : vector<10x8xf32>
    %cst_6 = arith.constant dense<0.000000e+00> : vector<10xf32>
    %35 = vector.multi_reduction <add>, %8, %cst_6 [1] : vector<10x8xf32> to vector<10xf32>
    %36 = vector.shape_cast %35 : vector<10xf32> to vector<10x1xf32>
    %37 = vector.broadcast %36 : vector<10x1xf32> to vector<10x8xf32>
    %38 = arith.mulf %8, %37 : vector<10x8xf32>
    %cst_7 = arith.constant dense<0.000000e+00> : vector<8xf32>
    %39 = vector.multi_reduction <add>, %38, %cst_7 [0] : vector<10x8xf32> to vector<8xf32>
    %40 = vector.shape_cast %39 : vector<8xf32> to vector<1x8xf32>
    %c0_8 = arith.constant 0 : index
    %c0_9 = arith.constant 0 : index
    %41 = vector.load %arg2[%c0_8, %c0_9] : memref<1x8xf32, #tpu.memory_space<vmem>>, vector<1x8xf32>
    %42 = arith.mulf %41, %40 : vector<1x8xf32>
    %43 = math.log %42 : vector<1x8xf32>
    %44 = vector.broadcast %43 : vector<1x8xf32> to vector<10x8xf32>
    %45 = arith.mulf %44, %34 : vector<10x8xf32>
    %46 = arith.subf %15, %45 : vector<10x8xf32>
    %47 = math.exp %46 : vector<10x8xf32>
    %cst_10 = arith.constant dense<0.000000e+00> : vector<10xf32>
    %48 = vector.multi_reduction <add>, %47, %cst_10 [1] : vector<10x8xf32> to vector<10xf32>
    %49 = vector.shape_cast %48 : vector<10xf32> to vector<10x1xf32>
    %50 = math.log %49 : vector<10x1xf32>
    %51 = vector.broadcast %50 : vector<10x1xf32> to vector<10x8xf32>
    %52 = arith.subf %15, %51 : vector<10x8xf32>
    %53 = arith.mulf %52, %8 : vector<10x8xf32>
    %54 = vector.shape_cast %53 : vector<10x8xf32> to vector<1x10x8xf32>
    %cst_11 = arith.constant dense<0.000000e+00> : vector<1xf32>
    %55 = vector.multi_reduction <add>, %54, %cst_11 [1, 2] : vector<1x10x8xf32> to vector<1xf32>
    %56 = vector.shape_cast %55 : vector<1xf32> to vector<1x1x1xf32>
    %57 = vector.extract %56[0, 0, 0] : f32 from vector<1x1x1xf32>
    %cst_12 = arith.constant 0.000000e+00 : f32
    %58 = arith.subf %cst_12, %57 : f32
    %59 = vector.shape_cast %36 : vector<10x1xf32> to vector<1x10x1xf32>
    %cst_13 = arith.constant dense<0.000000e+00> : vector<1xf32>
    %60 = vector.multi_reduction <add>, %59, %cst_13 [1, 2] : vector<1x10x1xf32> to vector<1xf32>
    %61 = vector.shape_cast %60 : vector<1xf32> to vector<1x1x1xf32>
    %62 = vector.extract %61[0, 0, 0] : f32 from vector<1x1x1xf32>
    %63 = arith.divf %58, %62 : f32
    %c0_14 = arith.constant 0 : index
    %64 = memref.load %arg5[%c0_14] : memref<1xf32, #tpu.memory_space<smem>>
    memref.store %63, %arg5[%c0_14] : memref<1xf32, #tpu.memory_space<smem>>
    return
  }
}

</mosaic_0001>

<bundles_post_ra>
// kernel: is_supcon_loss.1
= control target key start
LH: loop header
LB: loop body
LE: loop exit
PB: predicated region body
PF: predicated region fallthrough
CT: control target
= control target key end

     0   :  { %11 = vsyncpa [#allocation5], 0  ;;  %s327_s0 = inlined_call_operand.vmem [shape: f32[10,8], index: 0, kind: input, shape index: {}]   ;;  %s328_s1 = inlined_call_operand.vmem [shape: s32[1,8], index: 1, kind: input, shape index: {}]   ;;  %s329_s2 = inlined_call_operand.vmem [shape: f32[1,8], index: 2, kind: input, shape index: {}]   ;;  %s330_s3 = inlined_call_operand.<no memory space> [shape: f32[1], index: 3, kind: input, shape index: {}]   ;;  %s331_s4 = inlined_call_operand.vmem [shape: s32[2], index: 4, kind: input, shape index: {}]   ;;  %s332_s5 = inlined_call_operand.hbm [shape: f32[1], index: 5, kind: output, shape index: {}]  }
   0x1   :  { %12 = vsyncpa [#allocation4], 0  ;;  %s27_s20 = sshll.u32 %s331_s4, 4  ;;  %s28_s20 = int_to_ptr.vmem [resolvable:$true] %s27_s20 }
   0x2   :  { %s219_s21 = scalar_lea.vmem %s28_s20, 16  ;;  %p224_p1 = scmp.lt.s32.totalorder %s28_s20, %s28_s20 }
   0x3   :  { %p220_p0 = scmp.ne.s32.totalorder %s28_s20, %s219_s21  ;;  %p225_p2 = scmp.lt.s32.totalorder %s219_s21, %s219_s21 }
   0x5   :  { %p226_p3 = por %p225_p2, %p224_p1 }
   0x7   :  { %p227_p4 = pnand %p226_p3, %p220_p0 }
   0x9   :  { %230 = shalt.err (!%p227_p4)
}
   0xa   :  { %s243_s22 = smov [#allocation3]  }
   0xb   :  { %30 = dma.vmem_to_smem %s28_s20, 16, %s243_s22, [#allocation5]  }
   0xc   :  { %239 = dma.done.wait [#allocation5], 16  }
   0xd   :  { %240 = vsyncadd [#allocation5], 4294967280 }
   0xe   :  { %34 = sfence }
   0xf   :  { %v39_v0 = vlaneseq  ;;  %v54_v1 = vstv %s330_s3  ;;  %v52_v2 = vld [vmem:[%s327_s0] sm:$0xff]  ;;  %v53_v3 = vld [vmem:[%s327_s0 + $0x8] sm:$0x3]  ;;  %vm57_vm0 = vcmask 64512   ;;  %vm61_vm1 = vcmask 58368   ;;  %s36_s0 = sld [smem:[#allocation3]] }
  0x10   :  { %v288_v5 = vmul.f32 %v54_v1, %v52_v2  ;;  %v290_v6 = vmul.f32 %v54_v1, %v53_v3  ;;  %v38_v7 = vld [vmem:[%s328_s1] sm:$0x1]  ;;  %v244_v13 = vmov 0.0   ;;  %s192_s1 = sld [smem:[#allocation3 + $0x1]]  ;;  %vm160_vm13 = vcmask 1024   ;;  %s245_s10 = smov [#allocation6]  }
  0x11   :  { %v40_v4 = vshrl.u32 %v39_v0, 7  ;;  %v113_v38 = vld [vmem:[%s329_s2] sm:$0x1]  ;;  %vm158_vm14 = vcmask 7168  }
  0x12   :  { %v58_v10 = vsel %vm57_vm0, %v288_v5, -inf  ;;  %v62_v12 = vsel %vm61_vm1, %v290_v6, -inf }
  0x13   :  { %v44_v8 = vsub.s32 0, %v40_v4  ;;  %v41_v9 = vadd.s32 8, %v40_v4  ;;  %59 = vmax.xlane.f32.xlu1 %v58_v10 }
  0x15   :  { %v45_v11 = vrot.slane %v38_v7, %v44_v8  ;;  %v67_v18 = vstv %s36_s0 }
  0x16   :  { %v70_v19 = vstv %s192_s1  ;;  %vm79_vm4 = vcmp.lt.s32.totalorder %v38_v7, %v67_v18  ;;  %vm68_vm7 = vcmp.lt.s32.totalorder %v40_v4, %v67_v18  ;;  %vm69_vm10 = vcmp.lt.s32.totalorder %v41_v9, %v67_v18 }
  0x17   :  { %vm46_vm2 = vcmp.eq.s32.totalorder %v40_v4, %v45_v11  ;;  %vm47_vm3 = vcmp.eq.s32.totalorder %v41_v9, %v45_v11  ;;  %63 = vmax.xlane.f32.xlu1 %v62_v12  ;;  %vm80_vm5 = vcmp.ge.s32.totalorder %v38_v7, %v70_v19  ;;  %vm71_vm8 = vcmp.ge.s32.totalorder %v40_v4, %v70_v19 }
  0x18   :  { %v299_v14 = vsel %vm46_vm2, 1.0, %v244_v13  ;;  %v301_v15 = vsel %vm47_vm3, 1.0, %v244_v13  ;;  %vm81_vm6 = vmor %vm79_vm4, %vm80_vm5  ;;  %vm72_vm11 = vcmp.ge.s32.totalorder %v41_v9, %v70_v19 }
  0x19   :  { %v96_v16 = vsel %vm57_vm0, %v299_v14, 0.0  ;;  %v99_v17 = vsel %vm61_vm1, %v301_v15, 0.0  ;;  %v197_v20 = vsel %vm81_vm6, 1.0, %v244_v13  ;;  %vm73_vm9 = vmor %vm68_vm7, %vm71_vm8  ;;  %v92_v42 = vsub.f32 1.0, %v299_v14 }
  0x1a   :  { %97 = vadd.xlane.f32.xlu0 %v96_v16  ;;  %v88_v21 = vrot.slane %v197_v20, %v44_v8  ;;  %v195_v22 = vsel %vm73_vm9, 1.0, %v244_v13  ;;  %vm74_vm12 = vmor %vm69_vm10, %vm72_vm11  ;;  %v93_v43 = vsub.f32 1.0, %v301_v15 }
  0x1b   :  { %v196_v24 = vsel %vm74_vm12, 1.0, %v244_v13 }
  0x1c   :  { %v90_v23 = vmul.f32 %v195_v22, %v88_v21  ;;  %v91_v25 = vmul.f32 %v196_v24, %v88_v21 }
  0x1e   :  { %100 = vadd.xlane.f32.xlu0 %v99_v17  ;;  %v94_v46 = vmul.f32 %v92_v42, %v90_v23  ;;  %v95_v48 = vmul.f32 %v93_v43, %v91_v25 }
  0x9c   :  { %v60_v41 = vpop.xlane.xlu1 %59 }
  0x9d   :  { %v65_v51 = vsub.f32 %v288_v5, %v60_v41 }
  0xa0   :  { %v64_v45 = vpop.xlane.xlu1 %63 }
  0xa1   :  { %v66_v50 = vsub.f32 %v290_v6, %v64_v45 }
  0xa3   :  { %v98_v26 = vpop.xlane.xlu0 %97 }
  0xa4   :  { %v102_v27 = vmul.f32 %v299_v14, %v98_v26  ;;  %v159_v63 = vsel %vm158_vm14, %v98_v26, 0.0 }
  0xa6   :  { %v104_v30 = vsel %vm57_vm0, %v102_v27, 0.0 }
  0xa7   :  { %v101_v28 = vpop.xlane.xlu0 %100 }
  0xa8   :  { %v103_v29 = vmul.f32 %v301_v15, %v101_v28  ;;  %v161_v61 = vsel %vm160_vm13, %v101_v28, 0.0 }
  0xa9   :  { %v162_v0 = vadd.f32 %v161_v61, %v159_v63 }
  0xaa   :  { %v105_v31 = vsel %vm61_vm1, %v103_v29, 0.0 }
  0xab   :  { %v106_v32 = vadd.f32 %v105_v31, %v104_v30 }
  0xad   :  { %v107_v33 = vrot.slane %v106_v32, 4 }
  0xaf   :  { %v108_v34 = vadd.f32 %v107_v33, %v106_v32 }
  0xb1   :  { %v109_v35 = vrot.slane %v108_v34, 2 }
  0xb3   :  { %v110_v36 = vadd.f32 %v109_v35, %v108_v34 }
  0xb5   :  { %v111_v37 = vrot.slane %v110_v36, 1 }
  0xb7   :  { %v112_v39 = vadd.f32 %v111_v37, %v110_v36 }
  0xb9   :  { %v114_v40 = vmul.f32 %v113_v38, %v112_v39 }
  0xbb   :  { %207 = vlog2.f32 %v114_v40 }
  0xc8   :  { %v208_v44 = vpop.eup %207 }
  0xc9   :  { %v116_v47 = vmul.f32 0.6931472, %v208_v44 }
  0xcb   :  { %v121_v49 = vrot.slane %v116_v47, %v44_v8 }
  0xcd   :  { %v123_v52 = vmul.f32 %v121_v49, %v94_v46  ;;  %v124_v53 = vmul.f32 %v121_v49, %v95_v48 }
  0xcf   :  { %v125_v54 = vsub.f32 %v65_v51, %v123_v52  ;;  %v126_v55 = vsub.f32 %v66_v50, %v124_v53 }
  0xd1   :  { %v127_v56 = vmul.f32 1.442695, %v125_v54  ;;  %v129_v57 = vmul.f32 1.442695, %v126_v55 }
  0xd3   :  { %209 = vpow2.f32 %v127_v56 }
  0xd4   :  { %211 = vpow2.f32 %v129_v57 }
  0xe0   :  { %v210_v58 = vpop.eup %209 }
  0xe1   :  { %v212_v59 = vpop.eup %211  ;;  %v131_v60 = vsel %vm57_vm0, %v210_v58, 0.0 }
  0xe2   :  { %v134_v62 = vsel %vm61_vm1, %v212_v59, 0.0  ;;  %132 = vadd.xlane.f32.xlu0 %v131_v60 }
  0xe3   :  { %135 = vadd.xlane.f32.xlu1 %v134_v62 }
  0xe7   :  { %163 = vadd.xlane.f32.xlu1 %v162_v0 }
 0x16b   :  { %v133_v1 = vpop.xlane.xlu0 %132 }
 0x16c   :  { %v136_v2 = vpop.xlane.xlu1 %135  ;;  %213 = vlog2.f32 %v133_v1 }
 0x16d   :  { %215 = vlog2.f32 %v136_v2 }
 0x170   :  { %v164_v16 = vpop.xlane.xlu1 %163 }
 0x171   :  { %v165_v17 = vrot.slane %v164_v16, 4 }
 0x173   :  { %v166_v18 = vadd.f32 %v165_v17, %v164_v16 }
 0x175   :  { %v167_v19 = vrot.slane %v166_v18, 2 }
 0x177   :  { %v168_v23 = vadd.f32 %v167_v19, %v166_v18 }
 0x179   :  { %v214_v3 = vpop.eup %213  ;;  %v169_v26 = vrot.slane %v168_v23, 1 }
 0x17a   :  { %v216_v4 = vpop.eup %215  ;;  %v138_v5 = vmul.f32 0.6931472, %v214_v3 }
 0x17b   :  { %v140_v6 = vmul.f32 0.6931472, %v216_v4 }
 0x17c   :  { %v141_v7 = vsub.f32 %v65_v51, %v138_v5 }
 0x17d   :  { %v142_v8 = vsub.f32 %v66_v50, %v140_v6 }
 0x17e   :  { %v143_v9 = vmul.f32 %v299_v14, %v141_v7 }
 0x17f   :  { %v144_v10 = vmul.f32 %v301_v15, %v142_v8  ;;  %v170_v15 = vadd.f32 %v169_v26, %v168_v23 }
 0x180   :  { %v145_v11 = vsel %vm57_vm0, %v143_v9, 0.0 }
 0x181   :  { %v146_v12 = vsel %vm61_vm1, %v144_v10, 0.0 }
 0x182   :  { %v147_v13 = vadd.f32 %v146_v12, %v145_v11 }
 0x184   :  { %148 = vadd.xlane.f32.xlu0 %v147_v13 }
 0x20d   :  { %v149_v20 = vpop.xlane.xlu0 %148 }
 0x20e   :  { %v150_v21 = vrot.slane %v149_v20, 4 }
 0x210   :  { %v151_v22 = vadd.f32 %v150_v21, %v149_v20 }
 0x212   :  { %v152_v24 = vrot.slane %v151_v22, 2 }
 0x214   :  { %v153_v25 = vadd.f32 %v152_v24, %v151_v22 }
 0x216   :  { %v154_v14 = vrot.slane %v153_v25, 1 }
 0x218   :  { %v155_v27 = vadd.f32 %v154_v14, %v153_v25 }
 0x21a   :  { %198 = vpush %v155_v27 }
 0x21b   :  { %200 = vpush %v170_v15 }
 0x24b   :  { %s199_s2 = spop %198 }
 0x24c   :  { %s201_s6 = spop %200  ;;  %s157_s7 = ssub.f32 0.0, %s199_s2 }
 0x24d   :  { %v172_v28 = vstv %s201_s6 }
 0x24e   :  { %217 = vrcp.f32 %v172_v28 }
 0x25b   :  { %v218_v29 = vpop.eup %217 }
 0x25c   :  { %202 = vpush %v218_v29 }
 0x28d   :  { %s203_s8 = spop %202 }
 0x28e   :  { %s175_s9 = smul.f32 %s203_s8, %s157_s7 }
 0x290   :  { %177 = sst [smem:[#allocation6]] %s175_s9 }
 0x291   :  { %185 = dma.smem_to_hbm %s245_s10, 16, %s332_s5, [#allocation4]  }
 0x292   :  { %241 = dma.done.wait [#allocation4], 16  }
 0x293   :  { %242 = vsyncadd [#allocation4], 4294967280 }
 0x294   :  { %189 = sfence }
 0x295   :  { %190 = vsyncpa [#allocation4], 1 }
 0x296   :  { %191 = vsyncpa [#allocation5], 1 }

</bundles_post_ra>
